<compile_context>
chip_gen: v6e
topology: v6e:2x2x1
jax: 0.10.0
libtpu: 0.0.40
codegen_flags: <defaults>
</compile_context>

<pallas_src>
import functools

import jax
import jax.numpy as jnp
from jax.experimental import pallas as pl
from jax.experimental.pallas import tpu as pltpu


def _round_up(a, b):
    return pl.cdiv(a, b) * b


def _fake_quant_kernel(x_ref, o_ref, *, qmin, qmax, clip_ratio):
    # x_ref / o_ref: (tm, red) tile; the whole reduction row is resident in
    # this block, so the per-token reduction is local.  Tail rows of the last
    # (partial) grid block may hold stale data, but their outputs are masked
    # off by Pallas, and nothing here mixes data across rows.
    x = x_ref[...]

    # Row-wise min/max in the native dtype (monotone -> exact); only the
    # (tm, 1) results are upcast to f32 for the scale math.
    xmax = jnp.max(x, axis=-1, keepdims=True).astype(jnp.float32) * clip_ratio
    xmin = jnp.min(x, axis=-1, keepdims=True).astype(jnp.float32) * clip_ratio

    # Symmetric scale, zero-point == 0.
    scale = jnp.maximum(jnp.minimum(xmin, 0.0) / qmin,
                        jnp.maximum(xmax, 1e-6) / qmax)

    # Per-row exact reciprocal (tm divides) instead of tm*red per-element
    # divides; the quantize pass is one fused expression (no named full-tile
    # f32 temporary) to keep VALU work minimal.
    inv_scale = 1.0 / scale
    o_ref[...] = (jnp.clip(jnp.round(x.astype(jnp.float32) * inv_scale),
                           float(qmin), float(qmax)) * scale
                  ).astype(o_ref.dtype)


def quantizer_forward(x, *, bits=8, sym=True, clip_ratio=1.0,
                      dynamic=True, dynamic_method="pertoken",
                      group_size=-1, token_tile=None):
    """Pallas equivalent of Quantizer.forward (dynamic, symmetric, per-token)."""
    if bits > 16:
        return x
    if dynamic and bits >= 16:
        return x
    assert dynamic, "only the dynamic path is implemented"
    assert sym, "only symmetric quantization is implemented"
    assert dynamic_method == "pertoken", "only per-token is implemented"
    assert group_size == -1, "group quantization not implemented"

    qmax = 2 ** (bits - 1) - 1
    qmin = -(2 ** (bits - 1))

    ori_shape = x.shape
    ndim = x.ndim
    # torch: reduce over dims range(min(2, ndim-1), ndim), keepdim=True
    # -> flatten leading "token" dims and trailing "reduced" dims into 2-D.
    lead_dims = min(2, ndim - 1)
    tokens = 1
    for d in ori_shape[:lead_dims]:
        tokens *= d
    red = 1
    for d in ori_shape[lead_dims:]:
        red *= d
    x2d = x.reshape(tokens, red)

    itemsize = jnp.dtype(x.dtype).itemsize

    # Generation-aware VMEM budgeting.
    try:
        vmem_cap = int(pltpu.get_tpu_info().vmem_capacity_bytes)
    except Exception:  # pragma: no cover - fallback if info unavailable
        vmem_cap = 64 * 1024 * 1024
    if vmem_cap >= 96 * 1024 * 1024:        # v5e / v6e: 128 MiB per core
        vmem_budget = 44 * 1024 * 1024
        vmem_limit = 100 * 1024 * 1024
    else:                                    # v7x: 64 MiB per core
        vmem_budget = 22 * 1024 * 1024
        vmem_limit = 44 * 1024 * 1024

    # Sublane packing for the dtype: 8 rows (f32), 16 (bf16), 32 (int8/fp8).
    sub = max(8, 32 // itemsize)

    # Per-row residency: double-buffered in + out tiles (2*2*itemsize) plus
    # ~two full-tile f32 temporaries materialized by the elementwise chain.
    bytes_per_row = red * (4 * itemsize + 8)
    tm = max(sub, (vmem_budget // bytes_per_row) // sub * sub)
    if token_tile is not None:
        tm = max(sub, _round_up(int(token_tile), sub))
    # Keep >= 2 grid steps so both v7x TensorCores get work (when possible).
    if tokens > sub:
        tm = min(tm, _round_up(pl.cdiv(tokens, 2), sub))
    tm = min(tm, _round_up(tokens, sub))
    tm = max(tm, sub)

    grid = (pl.cdiv(tokens, tm),)

    kernel = functools.partial(_fake_quant_kernel,
                               qmin=qmin, qmax=qmax, clip_ratio=clip_ratio)

    out2d = pl.pallas_call(
        kernel,
        out_shape=jax.ShapeDtypeStruct((tokens, red), x.dtype),
        grid_spec=pltpu.PrefetchScalarGridSpec(
            num_scalar_prefetch=0,
            grid=grid,
            # block last dim == full array dim (legal even if red % 128 != 0);
            # partial last token block is masked by Pallas on writes.
            in_specs=[pl.BlockSpec((tm, red), lambda i: (i, 0))],
            out_specs=pl.BlockSpec((tm, red), lambda i: (i, 0)),
        ),
        compiler_params=pltpu.CompilerParams(
            dimension_semantics=("parallel",),
            vmem_limit_bytes=vmem_limit,
        ),
        cost_estimate=pl.CostEstimate(
            flops=10 * tokens * red,
            transcendentals=0,
            bytes_accessed=2 * tokens * red * itemsize,
        ),
    )(x2d)

    return out2d.reshape(ori_shape)


def _reference(x, bits=8, clip_ratio=1.0):
    # pure-JAX reference of the PyTorch semantics, for a quick self-check.
    qmax = 2 ** (bits - 1) - 1
    qmin = -(2 ** (bits - 1))
    ndim = x.ndim
    axes = tuple(range(min(2, ndim - 1), ndim))
    xf = x.astype(jnp.float32)
    xmax = jnp.max(xf, axis=axes, keepdims=True) * clip_ratio
    xmin = jnp.min(xf, axis=axes, keepdims=True) * clip_ratio
    scale = jnp.maximum(jnp.minimum(xmin, 0.0) / qmin,
                        jnp.maximum(xmax, 1e-6) / qmax)
    x_int = jnp.clip(jnp.round(xf / scale), qmin, qmax)
    return (x_int * scale).astype(x.dtype), scale


def _check(out, x, bits=8):
    ref, scale = _reference(x, bits=bits)
    diff = jnp.abs(out.astype(jnp.float32) - ref.astype(jnp.float32))
    # reciprocal-vs-divide rounding-bin flips and bf16 output rounding are
    # both bounded by ~one quantization step per row.
    tol = jnp.broadcast_to(scale * 1.01 + 1e-6, diff.shape)
    assert bool(jnp.all(diff <= tol)), float(jnp.max(diff - tol))


if __name__ == "__main__":
    key = jax.random.PRNGKey(0)
    B, S, H = 2, 8, 32
    x = jax.random.normal(key, (B, S, H), dtype=jnp.float32)

    out = jax.block_until_ready(
        quantizer_forward(x, bits=8, sym=True, dynamic=True,
                          dynamic_method="pertoken"))
    assert out.shape == x.shape and out.dtype == x.dtype
    _check(out, x, bits=8)

    # bf16 input with a token count not divisible by the tile / sublane pack
    # and H not a multiple of 128 — exercises the partial-last-block path
    # (no wrapper padding or slicing anymore).
    xb = jax.random.normal(jax.random.PRNGKey(1), (3, 5, 96),
                           dtype=jnp.bfloat16)
    outb = jax.block_until_ready(quantizer_forward(xb, bits=8))
    assert outb.shape == xb.shape and outb.dtype == xb.dtype
    _check(outb, xb, bits=8)

    # 2-D input (single leading token dim) with ragged rows.
    x2 = jax.random.normal(jax.random.PRNGKey(2), (37, 130),
                           dtype=jnp.float32)
    out2 = jax.block_until_ready(quantizer_forward(x2, bits=4))
    assert out2.shape == x2.shape and out2.dtype == x2.dtype
    _check(out2, x2, bits=4)

    # bits == 16 -> identity passthrough, as in the PyTorch module defaults.
    out16 = jax.block_until_ready(quantizer_forward(x, bits=16))
    assert jnp.array_equal(out16, x)

    print("KERNEL_OK")
</pallas_src>

<mosaic_0001>
module attributes {stable_mosaic.version = 11 : i64} {
  func.func @_fake_quant_kernel(%arg0: i32, %arg1: memref<8x32xf32, #tpu.memory_space<vmem>>, %arg2: memref<8x32xf32, #tpu.memory_space<vmem>>) attributes {dimension_semantics = [#tpu.dimension_semantics<parallel>], iteration_bounds = array<i64: 2>, scalar_prefetch = 0 : i64, scratch_operands = 0 : i64, tpu.core_type = #tpu.core_type<tc>, window_params = [{transform_indices = @transform_0, window_bounds = array<i64: 8, 32>}, {transform_indices = @transform_1, window_bounds = array<i64: 8, 32>}]} {
    %c0 = arith.constant 0 : index
    %c0_0 = arith.constant 0 : index
    %0 = vector.load %arg1[%c0, %c0_0] : memref<8x32xf32, #tpu.memory_space<vmem>>, vector<8x32xf32>
    %cst = arith.constant dense<0xFF800000> : vector<8xf32>
    %1 = vector.multi_reduction <maximumf>, %0, %cst [1] : vector<8x32xf32> to vector<8xf32>
    %2 = vector.shape_cast %1 : vector<8xf32> to vector<8x1xf32>
    %cst_1 = arith.constant 1.000000e+00 : f32
    %3 = vector.broadcast %cst_1 : f32 to vector<8x1xf32>
    %4 = arith.mulf %2, %3 : vector<8x1xf32>
    %cst_2 = arith.constant dense<0x7F800000> : vector<8xf32>
    %5 = vector.multi_reduction <minimumf>, %0, %cst_2 [1] : vector<8x32xf32> to vector<8xf32>
    %6 = vector.shape_cast %5 : vector<8xf32> to vector<8x1xf32>
    %cst_3 = arith.constant 1.000000e+00 : f32
    %7 = vector.broadcast %cst_3 : f32 to vector<8x1xf32>
    %8 = arith.mulf %6, %7 : vector<8x1xf32>
    %cst_4 = arith.constant 0.000000e+00 : f32
    %9 = vector.broadcast %cst_4 : f32 to vector<8x1xf32>
    %10 = arith.minimumf %8, %9 : vector<8x1xf32>
    %cst_5 = arith.constant -1.280000e+02 : f32
    %11 = vector.broadcast %cst_5 : f32 to vector<8x1xf32>
    %12 = arith.divf %10, %11 : vector<8x1xf32>
    %cst_6 = arith.constant 9.99999997E-7 : f32
    %13 = vector.broadcast %cst_6 : f32 to vector<8x1xf32>
    %14 = arith.maximumf %4, %13 : vector<8x1xf32>
    %cst_7 = arith.constant 1.270000e+02 : f32
    %15 = vector.broadcast %cst_7 : f32 to vector<8x1xf32>
    %16 = arith.divf %14, %15 : vector<8x1xf32>
    %17 = arith.maximumf %12, %16 : vector<8x1xf32>
    %cst_8 = arith.constant 1.000000e+00 : f32
    %18 = vector.broadcast %cst_8 : f32 to vector<8x1xf32>
    %19 = arith.divf %18, %17 : vector<8x1xf32>
    %20 = vector.broadcast %19 : vector<8x1xf32> to vector<8x32xf32>
    %21 = arith.mulf %0, %20 : vector<8x32xf32>
    %22 = math.roundeven %21 : vector<8x32xf32>
    %cst_9 = arith.constant -1.280000e+02 : f32
    %cst_10 = arith.constant 1.270000e+02 : f32
    %23 = vector.broadcast %cst_9 : f32 to vector<8x32xf32>
    %24 = arith.maximumf %23, %22 : vector<8x32xf32>
    %25 = vector.broadcast %cst_10 : f32 to vector<8x32xf32>
    %26 = arith.minimumf %25, %24 : vector<8x32xf32>
    %27 = vector.broadcast %17 : vector<8x1xf32> to vector<8x32xf32>
    %28 = arith.mulf %26, %27 : vector<8x32xf32>
    %c0_11 = arith.constant 0 : index
    %c0_12 = arith.constant 0 : index
    %29 = vector.load %arg2[%c0_11, %c0_12] : memref<8x32xf32, #tpu.memory_space<vmem>>, vector<8x32xf32>
    tpu.vector_store %arg2[%c0_11, %c0_12], %28 {strides = array<i32>} : memref<8x32xf32, #tpu.memory_space<vmem>>, vector<8x32xf32>,
    return
  }
  func.func @transform_0(%arg0: i32) -> (i32, i32) {
    %c0_i32 = arith.constant 0 : i32
    %c0_i32_0 = arith.constant 0 : i32
    return %arg0, %c0_i32 : i32, i32
  }
  func.func @transform_1(%arg0: i32) -> (i32, i32) {
    %c0_i32 = arith.constant 0 : i32
    %c0_i32_0 = arith.constant 0 : i32
    return %arg0, %c0_i32 : i32, i32
  }
}

</mosaic_0001>

<bundles_post_ra>
// kernel: tpu_custom_call.1
= control target key start
LH: loop header
LB: loop body
LE: loop exit
PB: predicated region body
PF: predicated region fallthrough
CT: control target
= control target key end

     0   :  { %6 = vsyncpa [#allocation3], 0  ;;  %s561_s0 = inlined_call_operand.hbm [shape: f32[16,32], index: 0, kind: input, shape index: {}]   ;;  %s562_s1 = inlined_call_operand.hbm [shape: f32[16,32], index: 1, kind: output, shape index: {}]  }
   0x1   :  { %8 = vsyncpa [#allocation3 + $0x1], 0 }
   0x2   :  { %9 = vsyncpa [#allocation4], 0 }
   0x3   :  { %11 = vsyncpa [#allocation4 + $0x1], 0  ;;  %s413_s6 = smov 0   ;;  %s415_s7 = smov 0  }
   0x4   :  { %s417_s8 = smov 0   ;;  %s419_s9 = smov 0  }
   0x5 LB: > { %s434_s10 = sadd.s32 4294967295, %s399_s9   ;;  %s239_s11 = sadd.s32 4294967294, %s399_s9   ;;  %s399_s9 = sphi %s419_s9, %s579_s9   ;;  %s395_s8 = sphi %s417_s8, %s578_s8   ;;  %s391_s7 = sphi %s415_s7, %s577_s7   ;;  %s387_s6 = sphi %s413_s6, %s576_s6  }
   0x6   : > { %s438_s12 = sadd.s32 1, %s399_s9   ;;  %s24_s13 = sadd.s32 1, %s395_s8 }
   0x7   : > { %s21_s14 = ssub.s32 %s399_s9, %s438_s12  ;;  %p31_p0 = scmp.ne.s32.totalorder %s395_s8, %s391_s7 }
   0x8   : > { %p22_p1 = scmp.eq.s32.totalorder %s21_s14, 0  ;;  %p32_p2 = scmp.eq.s32.totalorder %s399_s9, 0 }
   0x9   : > { %p37_p3 = scmp.ne.s32.totalorder %s391_s7, %s387_s6  ;;  %p38_p4 = scmp.eq.s32.totalorder %s434_s10, 0 }
   0xa   : > { %s450_s15 = scalar_select %p22_p1, %s395_s8, %s24_s13  }
   0xb   : > { %p452_p5 = por %p32_p2, %p31_p0  ;;  %p456_p6 = por %p38_p4, %p37_p3 }
   0xc   : > { %p61_p7 = scmp.eq.s32.totalorder %s434_s10, 1  ;;  %p67_p8 = scmp.eq.s32.totalorder %s239_s11, 1 }
   0xd   : > { %s566_s17 = scalar_select %p456_p6, 1, 0 }
   0xe   : > { %p271_p10 = scmp.lt.s32.totalorder %s399_s9, 2  ;;  %p463_p11 = por %p61_p7, %p31_p0 }
   0xf   : > { %p467_p12 = por %p67_p8, %p37_p3  ;;  %s87_s20 = sand.u32 1, %s395_s8  }
  0x10   : > { %s567_s18 = scalar_select %p463_p11, 1, 0 }
  0x11   : > { %s568_s19 = scalar_select %p467_p12, 1, 0 }
  0x12   : > { %s243_s21 = sshll.u32 %s399_s9, 7  ;;  %s242_s22 = sshll.u32 %s87_s20, 3 }
  0x13   : > { %s476_s25 = scalar_lea.hbm %s561_s0, %s243_s21  ;;  %s91_s26 = scalar_lea.vmem [#allocation2], %s242_s22 }
  0x14   : > { %s98_s27 = sshll.u32 %s91_s26, 4  ;;  %p480_p13 = pnand %p271_p10, %p452_p5  ;;  %s484_s27 = int_to_ptr.vmem [resolvable:$true] %s98_s27 }
  0x15   : > { %s88_s29 = scalar_lea.sflag [#allocation3], %s87_s20  ;;  %s307_s30 = scalar_lea.hbm %s476_s25, 128 }
  0x16   : > { %p308_p2 = scmp.ne.s32.totalorder %s476_s25, %s307_s30  ;;  %p309_p3 = pneg %p480_p13 }
  0x17   : > { %s312_s4 = scalar_lea.hbm %s561_s0, 256  ;;  %p313_p5 = scmp.lt.s32.totalorder %s476_s25, %s561_s0 }
  0x18   : > { %p310_p4 = pnand %p309_p3, %p308_p2  ;;  %p314_p8 = scmp.lt.s32.totalorder %s312_s4, %s307_s30 }
  0x1a   : > { %p311_p7 = pneg %p310_p4  ;;  %p315_p10 = por %p314_p8, %p313_p5 }
  0x1c   : > { %p316_p9 = pnand %p315_p10, %p311_p7 }
  0x1e   : > { %319 = shalt.err (!%p316_p9)
}
  0x1f   : > { %s320_s13 = scalar_lea.vmem %s484_s27, 128  ;;  %s401_s14 = smov [#allocation2]  }
  0x20   : > { %p321_p0 = scmp.ne.s32.totalorder %s484_s27, %s320_s13  ;;  %s325_s16 = sshll.u32 %s401_s14, 4  ;;  %s326_s16 = int_to_ptr.vmem [resolvable:$false] %s325_s16 }
  0x21   : > { %s327_s20 = scalar_lea.vmem %s326_s16, 256  ;;  %p328_p4 = scmp.lt.s32.totalorder %s484_s27, %s326_s16 }
  0x22   : > { %p323_p1 = pnand %p321_p0, %p309_p3  ;;  %p329_p12 = scmp.lt.s32.totalorder %s327_s20, %s320_s13 }
  0x24   : > { %p324_p2 = pneg %p323_p1  ;;  %p330_p11 = por %p329_p12, %p328_p4 }
  0x26   : > { %p331_p6 = pnand %p330_p11, %p324_p2 }
  0x28   : > { %334 = shalt.err (!%p331_p6)
}
  0x29   : > { %266 = dma.hbm_to_vmem [thread:$0]  (!%p480_p13), %s476_s25, 128, %s484_s27, %s88_s29  }
  0x2a   : > { %p570_p9 = scmp.lt.s32.totalorder %s399_s9, 3  ;;  %p571_p7 = scmp.ge.s32.totalorder %s399_s9, 1 }
  0x2c   : > { %p104_p0 = pnand %p571_p7, %p570_p9 }
  0x2d   : > { %s511_s21 = sand.u32 (!%p104_p0), 1, %s391_s7   ;;  %p572_p6 = scmp.ne.s32.totalorder (!%p104_p0), %s566_s17, 0 }
  0x2e   : > { %107 = sbr.rel (%p104_p0) target bundleno = 246 (0xf6), region = 24  ;;  %s245_s22 = sshll.u32 (!%p104_p0), %s511_s21, 3 }
  0x2f   : > { %s110_s23 = scalar_lea.sflag (!%p104_p0), [#allocation3], %s511_s21  ;;  %s113_s24 = scalar_lea.vmem (!%p104_p0), [#allocation2], %s245_s22 }
  0x33   : > { %378 = dma.done.wait (%p572_p6), %s110_s23, 128  }
  0x34   : > { %380 = vsyncadd (%p572_p6), %s110_s23, 4294967168  ;;  %vm133_vm0 = vcmask 261120   ;;  %v132_v0 = vld [vmem:[%s113_s24] sm:$0xff]  ;;  %s248_s17 = sshll.u32 %s434_s10, 7  ;;  %s131_s25 = scalar_lea.vmem [#allocation5], %s245_s22 }
  0x35   : > { %v134_v1 = vsel %vm133_vm0, %v132_v0, -inf  ;;  %v137_v2 = vsel %vm133_vm0, %v132_v0, inf  ;;  %s169_s26 = sshll.u32 %s131_s25, 4  ;;  %s167_s29 = scalar_lea.hbm %s562_s1, %s248_s17  ;;  %s170_s26 = int_to_ptr.vmem [resolvable:$true] %s169_s26 }
  0x36   : > { %135 = vmax.xlane.f32.xlu0 %v134_v1  ;;  %s156_s30 = scalar_lea.sflag [#allocation4], %s511_s21  ;;  %s335_s2 = scalar_lea.vmem %s170_s26, 128 }
  0x37   : > { %p336_p11 = scmp.ne.s32.totalorder %s170_s26, %s335_s2  ;;  %p573_p12 = scmp.ne.s32.totalorder %s567_s18, 0 }
  0x38   : > { %s402_s3 = smov [#allocation5]  }
  0x39   : > { %p337_p13 = pnand %p336_p11, %p573_p12  ;;  %s339_s10 = sshll.u32 %s402_s3, 4  ;;  %s340_s10 = int_to_ptr.vmem [resolvable:$false] %s339_s10 }
  0x3a   : > { %138 = vmin.xlane.f32.xlu0 %v137_v2  ;;  %s341_s4 = scalar_lea.vmem %s340_s10, 256  ;;  %p342_p3 = scmp.lt.s32.totalorder %s170_s26, %s340_s10 }
  0x3b   : > { %p338_p1 = pneg %p337_p13  ;;  %p343_p5 = scmp.lt.s32.totalorder %s341_s4, %s335_s2 }
  0x3d   : > { %p344_p8 = por %p343_p5, %p342_p3 }
  0x3f   : > { %p345_p10 = pnand %p344_p8, %p338_p1 }
  0xbf   : > { %v136_v3 = vpop.xlane.xlu0 %135 }
  0xc0   : > { %v143_v4 = vmax.f32 %v136_v3, 1e-06 }
  0xc2   : > { %v145_v7 = vmul.f32 0.007874016, %v143_v4 }
  0xc3   : > { %v139_v5 = vpop.xlane.xlu0 %138 }
  0xc4   : > { %v140_v6 = vmin.f32 %v139_v5, 0.0 }
  0xc6   : > { %v142_v8 = vmul.f32 -0.0078125, %v140_v6 }
  0xc8   : > { %v146_v9 = vmax.f32 %v142_v8, %v145_v7 }
  0xca   : > { %305 = vrcp.f32 %v146_v9 }
  0xd7   : > { %v306_v10 = vpop.eup %305 }
  0xd8   : > { %v149_v11 = vmul.f32 %v306_v10, %v132_v0 }
  0xda   : > { %v253_v12 = vcvt.f32.s32 %v149_v11  ;;  %v251_v14 = vand.u32 2147483647, %v149_v11  ;;  %v256_v16 = vand.u32 2147483648, %v149_v11 }
  0xdc   : > { %v254_v13 = vcvt.s32.f32 %v253_v12  ;;  %vm252_vm1 = vcmp.lt.f32.partialorder %v251_v14, 8388608.0 }
  0xde   : > { %v255_v15 = vand.u32 2147483647, %v254_v13 }
  0xe0   : > { %v257_v17 = vor.u32 %v256_v16, %v255_v15 }
  0xe2   : > { %v258_v18 = vsel %vm252_vm1, %v257_v17, %v149_v11 }
  0xe3   : > { %v151_v19 = vmax.f32 %v258_v18, -128.0 }
  0xe5   : > { %v152_v20 = vmin.f32 %v151_v19, 127.0 }
  0xe7   : > { %v153_v21 = vmul.f32 %v152_v20, %v146_v9 }
  0xe9   : > { %154 = vst.msk [vmem:[%s131_s25] sm:$0xff] %vm133_vm0, %v153_v21 }
  0xea   : > { %348 = shalt.err (!%p345_p10)
}
  0xeb   : > { %s349_s5 = scalar_lea.hbm %s167_s29, 128  ;;  %s353_s14 = scalar_lea.hbm %s562_s1, 256 }
  0xec   : > { %p350_p2 = scmp.ne.s32.totalorder %s167_s29, %s349_s5  ;;  %p354_p7 = scmp.lt.s32.totalorder %s167_s29, %s562_s1 }
  0xed   : > { %p355_p0 = scmp.lt.s32.totalorder %s353_s14, %s349_s5 }
  0xee   : > { %p351_p4 = pnand %p350_p2, %p573_p12 }
  0xef   : > { %p356_p6 = por %p355_p0, %p354_p7 }
  0xf0   : > { %p352_p9 = pneg %p351_p4 }
  0xf2   : > { %p357_p11 = pnand %p356_p6, %p352_p9 }
  0xf4   : > { %360 = shalt.err (!%p357_p11)
}
  0xf5   : > { %261 = dma.vmem_to_hbm [thread:$0]  (%p573_p12), %s170_s26, 128, %s167_s29, %s156_s30  }
  0xf6 PF: > { %s181_s21 = sand.u32 1, %s387_s6   ;;  %p574_p13 = scmp.ne.s32.totalorder %s568_s19, 0 }
  0xf7   : > { %p575_p1 = scmp.ge.s32.totalorder %s399_s9, 2  ;;  %s182_s22 = scalar_lea.sflag [#allocation4], %s181_s21 }
  0xf9   : > { %p268_p3 = pnand %p575_p1, %p574_p13 }
  0xfb   : > { %p269_p5 = pneg %p268_p3 }
  0xfd   : > { %382 = dma.done.wait (%p269_p5), %s182_s22, 128  }
  0xfe   : > { %384 = vsyncadd (%p269_p5), %s182_s22, 4294967168  ;;  %p14_p8 = scmp.ge.s32.totalorder %s438_s12, 4   ;;  %s576_s6 = smov %s391_s7 }
  0xff   : > { %s577_s7 = smov %s395_s8  ;;  %s578_s8 = smov %s450_s15 }
 0x100   : > { %s579_s9 = smov %s438_s12  ;;  %16 = sbr.rel (!%p14_p8) target bundleno = 5 (0x5), region = 69 }
 0x105   :  { %187 = vsyncpa [#allocation3], 1 }
 0x106   :  { %189 = vsyncpa [#allocation3 + $0x1], 1 }
 0x107   :  { %190 = vsyncpa [#allocation4], 1 }
 0x108   :  { %192 = vsyncpa [#allocation4 + $0x1], 1 }

</bundles_post_ra>
